<compile_context>
chip_gen: v6e
topology: v6e:2x2x1
jax: 0.10.0
libtpu: 0.0.40
codegen_flags: <defaults>
</compile_context>

<pallas_src>
import jax
import jax.numpy as jnp
from jax.experimental import pallas as pl
from jax.experimental.pallas import tpu as pltpu


def _dloss_kernel(img_ref, p0_ref, p1_ref, acc_ref):
    # img_ref: (bn, 2, H, W)  channels 0..1 of image_pro for this batch block
    # p0_ref:  (bn, H, W)
    # p1_ref:  (bn, H, W)
    # acc_ref: (H, W)         resident f32 accumulator (same block every step)
    @pl.when(pl.program_id(0) == 0)
    def _():
        acc_ref[...] = jnp.zeros_like(acc_ref)

    img = img_ref[...]                      # (bn, 2, H, W)
    d0 = img[:, 0] - p0_ref[...]            # (bn, H, W)
    d1 = img[:, 1] - p1_ref[...]            # (bn, H, W)
    # elementwise square + batch-block reduction, accumulated across the grid
    acc_ref[...] += jnp.sum(d0 * d0 + d1 * d1, axis=0)


def _pick_batch_block(n, h, w, budget_bytes=4 * 1024 * 1024):
    """Largest divisor of n whose double-buffered per-step footprint fits budget."""
    per_image = 4 * h * w * 4 * 2   # 4 f32 (H,W) planes per image, x2 double buffer
    bn = max(1, min(n, budget_bytes // max(per_image, 1)))
    while n % bn:
        bn -= 1
    return bn


def dloss(image_pro, pos_0, pos_1):
    """image_pro: (N, C>=2, H, W); pos_0, pos_1: (N, H, W) -> scalar loss."""
    N, C, H, W = image_pro.shape
    assert C >= 2, "DLoss uses image_pro[:, 0] and image_pro[:, 1]"
    assert pos_0.shape == (N, H, W) and pos_1.shape == (N, H, W)

    image_pro = image_pro.astype(jnp.float32)
    pos_0 = pos_0.astype(jnp.float32)
    pos_1 = pos_1.astype(jnp.float32)

    bn = _pick_batch_block(N, H, W)
    grid = (N // bn,)

    acc = pl.pallas_call(
        _dloss_kernel,
        out_shape=jax.ShapeDtypeStruct((H, W), jnp.float32),
        grid_spec=pltpu.PrefetchScalarGridSpec(
            num_scalar_prefetch=0,
            grid=grid,
            in_specs=[
                # only channels 0..1 of image_pro are tiled in (C may be > 2)
                pl.BlockSpec((bn, 2, H, W), lambda i: (i, 0, 0, 0)),
                pl.BlockSpec((bn, H, W), lambda i: (i, 0, 0)),
                pl.BlockSpec((bn, H, W), lambda i: (i, 0, 0)),
            ],
            out_specs=pl.BlockSpec((H, W), lambda i: (0, 0)),
        ),
        compiler_params=pltpu.CompilerParams(
            # single grid axis is a reduction into the resident output block
            dimension_semantics=("arbitrary",)),
    )(image_pro, pos_0, pos_1)

    # mean(sq0) + mean(sq1); both terms share the same element count N*H*W,
    # so the combined accumulator just gets one scale.
    return jnp.sum(acc) / jnp.float32(N * H * W)


if __name__ == "__main__":
    key = jax.random.PRNGKey(0)
    k1, k2, k3 = jax.random.split(key, 3)
    N, C, H, W = 2, 2, 16, 16
    image_pro = jax.random.normal(k1, (N, C, H, W), dtype=jnp.float32)
    pos_0 = jax.random.normal(k2, (N, H, W), dtype=jnp.float32)
    pos_1 = jax.random.normal(k3, (N, H, W), dtype=jnp.float32)

    loss = dloss(image_pro, pos_0, pos_1)
    jax.block_until_ready(loss)

    ref = (jnp.mean(jnp.square(image_pro[:, 0] - pos_0)) +
           jnp.mean(jnp.square(image_pro[:, 1] - pos_1)))
    assert loss.shape == ()
    assert jnp.allclose(loss, ref, atol=1e-5, rtol=1e-5), (loss, ref)

    print("KERNEL_OK")
</pallas_src>

<mosaic_0001>
module attributes {stable_mosaic.version = 11 : i64} {
  func.func @_dloss_kernel(%arg0: i32, %arg1: memref<2x2x16x16xf32, #tpu.memory_space<vmem>>, %arg2: memref<2x16x16xf32, #tpu.memory_space<vmem>>, %arg3: memref<2x16x16xf32, #tpu.memory_space<vmem>>, %arg4: memref<16x16xf32, #tpu.memory_space<vmem>>) attributes {dimension_semantics = [#tpu.dimension_semantics<arbitrary>], iteration_bounds = array<i64: 1>, scalar_prefetch = 0 : i64, scratch_operands = 0 : i64, tpu.core_type = #tpu.core_type<tc>, window_params = [{transform_indices = @transform_0, window_bounds = array<i64: 2, 2, 16, 16>}, {transform_indices = @transform_1, window_bounds = array<i64: 2, 16, 16>}, {transform_indices = @transform_2, window_bounds = array<i64: 2, 16, 16>}, {pipeline_mode = #tpu.pipeline_mode<synchronous>, transform_indices = @transform_3, window_bounds = array<i64: 16, 16>}]} {
    %c0_i32 = arith.constant 0 : i32
    %0 = arith.cmpi eq, %arg0, %c0_i32 : i32
    %1 = arith.extui %0 : i1 to i32
    %c0_i32_0 = arith.constant 0 : i32
    %2 = arith.cmpi ne, %1, %c0_i32_0 : i32
    scf.if %2 {
      %cst_14 = arith.constant 0.000000e+00 : f32
      %19 = vector.broadcast %cst_14 : f32 to vector<16x16xf32>
      %c0_15 = arith.constant 0 : index
      %c0_16 = arith.constant 0 : index
      %20 = vector.load %arg4[%c0_15, %c0_16] : memref<16x16xf32, #tpu.memory_space<vmem>>, vector<16x16xf32>
      tpu.vector_store %arg4[%c0_15, %c0_16], %19 {strides = array<i32>} : memref<16x16xf32, #tpu.memory_space<vmem>>, vector<16x16xf32>,
    } else {
    }
    %c0 = arith.constant 0 : index
    %c0_1 = arith.constant 0 : index
    %c0_2 = arith.constant 0 : index
    %c0_3 = arith.constant 0 : index
    %3 = vector.load %arg1[%c0, %c0_1, %c0_2, %c0_3] : memref<2x2x16x16xf32, #tpu.memory_space<vmem>>, vector<2x2x16x16xf32>
    %4 = vector.extract_strided_slice %3 {offsets = [0, 0, 0, 0], sizes = [2, 1, 16, 16], strides = [1, 1, 1, 1]} : vector<2x2x16x16xf32> to vector<2x1x16x16xf32>
    %5 = vector.shape_cast %4 : vector<2x1x16x16xf32> to vector<2x16x16xf32>
    %c0_4 = arith.constant 0 : index
    %c0_5 = arith.constant 0 : index
    %c0_6 = arith.constant 0 : index
    %6 = vector.load %arg2[%c0_4, %c0_5, %c0_6] : memref<2x16x16xf32, #tpu.memory_space<vmem>>, vector<2x16x16xf32>
    %7 = arith.subf %5, %6 : vector<2x16x16xf32>
    %8 = vector.extract_strided_slice %3 {offsets = [0, 1, 0, 0], sizes = [2, 1, 16, 16], strides = [1, 1, 1, 1]} : vector<2x2x16x16xf32> to vector<2x1x16x16xf32>
    %9 = vector.shape_cast %8 : vector<2x1x16x16xf32> to vector<2x16x16xf32>
    %c0_7 = arith.constant 0 : index
    %c0_8 = arith.constant 0 : index
    %c0_9 = arith.constant 0 : index
    %10 = vector.load %arg3[%c0_7, %c0_8, %c0_9] : memref<2x16x16xf32, #tpu.memory_space<vmem>>, vector<2x16x16xf32>
    %11 = arith.subf %9, %10 : vector<2x16x16xf32>
    %c0_10 = arith.constant 0 : index
    %c0_11 = arith.constant 0 : index
    %12 = vector.load %arg4[%c0_10, %c0_11] : memref<16x16xf32, #tpu.memory_space<vmem>>, vector<16x16xf32>
    %13 = arith.mulf %7, %7 : vector<2x16x16xf32>
    %14 = arith.mulf %11, %11 : vector<2x16x16xf32>
    %15 = arith.addf %13, %14 : vector<2x16x16xf32>
    %cst = arith.constant dense<0.000000e+00> : vector<16x16xf32>
    %16 = vector.multi_reduction <add>, %15, %cst [0] : vector<2x16x16xf32> to vector<16x16xf32>
    %17 = arith.addf %12, %16 : vector<16x16xf32>
    %c0_12 = arith.constant 0 : index
    %c0_13 = arith.constant 0 : index
    %18 = vector.load %arg4[%c0_12, %c0_13] : memref<16x16xf32, #tpu.memory_space<vmem>>, vector<16x16xf32>
    tpu.vector_store %arg4[%c0_12, %c0_13], %17 {strides = array<i32>} : memref<16x16xf32, #tpu.memory_space<vmem>>, vector<16x16xf32>,
    return
  }
  func.func @transform_0(%arg0: i32) -> (i32, i32, i32, i32) {
    %c0_i32 = arith.constant 0 : i32
    %c0_i32_0 = arith.constant 0 : i32
    %c0_i32_1 = arith.constant 0 : i32
    %c0_i32_2 = arith.constant 0 : i32
    return %arg0, %c0_i32, %c0_i32_0, %c0_i32_1 : i32, i32, i32, i32
  }
  func.func @transform_1(%arg0: i32) -> (i32, i32, i32) {
    %c0_i32 = arith.constant 0 : i32
    %c0_i32_0 = arith.constant 0 : i32
    %c0_i32_1 = arith.constant 0 : i32
    return %arg0, %c0_i32, %c0_i32_0 : i32, i32, i32
  }
  func.func @transform_2(%arg0: i32) -> (i32, i32, i32) {
    %c0_i32 = arith.constant 0 : i32
    %c0_i32_0 = arith.constant 0 : i32
    %c0_i32_1 = arith.constant 0 : i32
    return %arg0, %c0_i32, %c0_i32_0 : i32, i32, i32
  }
  func.func @transform_3(%arg0: i32) -> (i32, i32) {
    %c0_i32 = arith.constant 0 : i32
    %c0_i32_0 = arith.constant 0 : i32
    %c0_i32_1 = arith.constant 0 : i32
    return %c0_i32, %c0_i32_0 : i32, i32
  }
}

</mosaic_0001>

<bundles_post_ra>
// kernel: tpu_custom_call.1
= control target key start
LH: loop header
LB: loop body
LE: loop exit
PB: predicated region body
PF: predicated region fallthrough
CT: control target
= control target key end

     0   :  { %8 = vsyncpa [#allocation3], 0  ;;  %s282_s0 = inlined_call_operand.hbm [shape: f32[2,2,16,16], index: 0, kind: input, shape index: {}]   ;;  %s283_s1 = inlined_call_operand.hbm [shape: f32[2,16,16], index: 1, kind: input, shape index: {}]   ;;  %s284_s2 = inlined_call_operand.hbm [shape: f32[2,16,16], index: 2, kind: input, shape index: {}]   ;;  %s285_s3 = inlined_call_operand.hbm [shape: f32[16,16], index: 3, kind: output, shape index: {}]  }
   0x1   :  { %9 = vsyncpa [#allocation6], 0 }
   0x2   :  { %10 = vsyncpa [#allocation4], 0  ;;  %s223_s12 = smov [#allocation5]   ;;  %s224_s14 = smov [#allocation2]  }
   0x3   :  { %s28_s13 = sshll.u32 %s223_s12, 4  ;;  %s16_s15 = sshll.u32 %s224_s14, 4  ;;  %s29_s13 = int_to_ptr.vmem [resolvable:$true] %s28_s13  ;;  %s17_s15 = int_to_ptr.vmem [resolvable:$true] %s16_s15 }
   0x4   :  { %s145_s16 = scalar_lea.vmem %s29_s13, 512  ;;  %p150_p1 = scmp.lt.s32.totalorder %s29_s13, %s29_s13 }
   0x5   :  { %p146_p0 = scmp.ne.s32.totalorder %s29_s13, %s145_s16  ;;  %p151_p2 = scmp.lt.s32.totalorder %s145_s16, %s145_s16 }
   0x7   :  { %p152_p3 = por %p151_p2, %p150_p1 }
   0x9   :  { %p153_p4 = pnand %p152_p3, %p146_p0 }
   0xb   :  { %156 = shalt.err (!%p153_p4)
}
   0xc   :  { %s225_s17 = smov 128   ;;  %s226_s18 = smov 8  }
   0xd   :  { %34 = dma.hbm_to_vmem [thread:$0]  %s283_s1, 512, %s29_s13, [#allocation6], %s225_s17, %s225_s17, %s226_s18  }
   0xe   :  { %s165_s21 = scalar_lea.vmem %s17_s15, 1024  ;;  %p170_p6 = scmp.lt.s32.totalorder %s17_s15, %s17_s15 }
   0xf   :  { %p166_p5 = scmp.ne.s32.totalorder %s17_s15, %s165_s21  ;;  %p171_p7 = scmp.lt.s32.totalorder %s165_s21, %s165_s21 }
  0x11   :  { %p172_p8 = por %p171_p7, %p170_p6 }
  0x13   :  { %p173_p9 = pnand %p172_p8, %p166_p5 }
  0x15   :  { %176 = shalt.err (!%p173_p9)
}
  0x16   :  { %22 = dma.hbm_to_vmem [thread:$0]  %s282_s0, 1024, %s17_s15, [#allocation3], %s225_s17, %s225_s17, %s226_s18  }
  0x17   :  { %s227_s24 = smov [#allocation7]  }
  0x18   :  { %s40_s25 = sshll.u32 %s227_s24, 4  ;;  %s41_s25 = int_to_ptr.vmem [resolvable:$true] %s40_s25 }
  0x19   :  { %s185_s26 = scalar_lea.vmem %s41_s25, 512  ;;  %p190_p11 = scmp.lt.s32.totalorder %s41_s25, %s41_s25 }
  0x1a   :  { %p186_p10 = scmp.ne.s32.totalorder %s41_s25, %s185_s26  ;;  %p191_p12 = scmp.lt.s32.totalorder %s185_s26, %s185_s26 }
  0x1c   :  { %p192_p13 = por %p191_p12, %p190_p11 }
  0x1e   :  { %p193_p0 = pnand %p192_p13, %p186_p10 }
  0x20   :  { %196 = shalt.err (!%p193_p0)
}
  0x21   :  { %46 = dma.hbm_to_vmem [thread:$0]  %s284_s2, 512, %s41_s25, [#allocation6], %s225_s17, %s225_s17, %s226_s18  }
  0x22   :  { %217 = dma.done.wait [#allocation3], 1024  }
  0x23   :  { %218 = vsyncadd [#allocation3], 4294966272 }
  0x24   :  { %219 = dma.done.wait [#allocation6], 1024  }
  0x25   :  { %220 = vsyncadd [#allocation6], 4294966272  ;;  %vm60_vm0 = vcmask 130048   ;;  %v228_v0 = vmov 0.0   ;;  %v63_v1 = vld [vmem:[#allocation2] sm:$0xff]  ;;  %v65_v2 = vld [vmem:[#allocation2 + $0x10] sm:$0xff] }
  0x26   :  { %61 = vst.msk [vmem:[#allocation8] sm:$0xff] %vm60_vm0, %v228_v0  ;;  %62 = vst.msk [vmem:[#allocation8 + $0x8] sm:$0xff] %vm60_vm0, %v228_v0  ;;  %v67_v3 = vld [vmem:[#allocation2 + $0x20] sm:$0xff]  ;;  %v69_v4 = vld [vmem:[#allocation2 + $0x30] sm:$0xff]  ;;  %s229_s0 = smov [#allocation8]  }
  0x27   :  { %v71_v5 = vld [vmem:[#allocation5] sm:$0xff]  ;;  %v73_v6 = vld [vmem:[#allocation5 + $0x10] sm:$0xff]  ;;  %v64_v13 = vld [vmem:[#allocation2 + $0x8] sm:$0xff]  ;;  %s117_s2 = sshll.u32 %s229_s0, 4  ;;  %s118_s2 = int_to_ptr.vmem [resolvable:$true] %s117_s2 }
  0x28   :  { %v75_v7 = vsub.f32 %v63_v1, %v71_v5  ;;  %v77_v8 = vsub.f32 %v67_v3, %v73_v6  ;;  %v79_v9 = vld [vmem:[#allocation7] sm:$0xff]  ;;  %v81_v10 = vld [vmem:[#allocation7 + $0x10] sm:$0xff]  ;;  %v66_v14 = vld [vmem:[#allocation2 + $0x18] sm:$0xff]  ;;  %s197_s28 = scalar_lea.vmem %s118_s2, 256  ;;  %p202_p2 = scmp.lt.s32.totalorder %s118_s2, %s118_s2 }
  0x29   :  { %v83_v11 = vsub.f32 %v65_v2, %v79_v9  ;;  %v85_v12 = vsub.f32 %v69_v4, %v81_v10  ;;  %v68_v15 = vld [vmem:[#allocation2 + $0x28] sm:$0xff]  ;;  %v70_v18 = vld [vmem:[#allocation2 + $0x38] sm:$0xff]  ;;  %p198_p1 = scmp.ne.s32.totalorder %s118_s2, %s197_s28  ;;  %p203_p3 = scmp.lt.s32.totalorder %s197_s28, %s197_s28 }
  0x2a   :  { %v89_v16 = vmul.f32 %v75_v7, %v75_v7  ;;  %v91_v17 = vmul.f32 %v77_v8, %v77_v8  ;;  %v72_v19 = vld [vmem:[#allocation5 + $0x8] sm:$0xff]  ;;  %v74_v20 = vld [vmem:[#allocation5 + $0x18] sm:$0xff] }
  0x2b   :  { %v93_v21 = vmul.f32 %v83_v11, %v83_v11  ;;  %v95_v22 = vmul.f32 %v85_v12, %v85_v12  ;;  %v76_v23 = vsub.f32 %v64_v13, %v72_v19  ;;  %v78_v24 = vsub.f32 %v68_v15, %v74_v20  ;;  %v80_v25 = vld [vmem:[#allocation7 + $0x8] sm:$0xff]  ;;  %v82_v26 = vld [vmem:[#allocation7 + $0x18] sm:$0xff]  ;;  %p204_p4 = por %p203_p3, %p202_p2 }
  0x2c   :  { %v84_v27 = vsub.f32 %v66_v14, %v80_v25  ;;  %v86_v28 = vsub.f32 %v70_v18, %v82_v26 }
  0x2d   :  { %v97_v29 = vadd.f32 %v93_v21, %v89_v16  ;;  %v99_v30 = vadd.f32 %v95_v22, %v91_v17  ;;  %v90_v31 = vmul.f32 %v76_v23, %v76_v23  ;;  %v92_v32 = vmul.f32 %v78_v24, %v78_v24  ;;  %v87_v35 = vld [vmem:[#allocation8] sm:$0xff]  ;;  %v88_v42 = vld [vmem:[#allocation8 + $0x8] sm:$0xff]  ;;  %p205_p5 = pnand %p204_p4, %p198_p1 }
  0x2e   :  { %v94_v33 = vmul.f32 %v84_v27, %v84_v27  ;;  %v96_v34 = vmul.f32 %v86_v28, %v86_v28 }
  0x2f   :  { %v102_v36 = vsel %vm60_vm0, %v97_v29, 0.0  ;;  %v103_v37 = vsel %vm60_vm0, %v99_v30, 0.0 }
  0x30   :  { %v104_v38 = vadd.f32 %v103_v37, %v102_v36  ;;  %v98_v39 = vadd.f32 %v94_v33, %v90_v31  ;;  %v100_v40 = vadd.f32 %v96_v34, %v92_v32 }
  0x32   :  { %v108_v41 = vadd.f32 %v104_v38, %v87_v35  ;;  %v105_v43 = vsel %vm60_vm0, %v98_v39, 0.0  ;;  %v106_v44 = vsel %vm60_vm0, %v100_v40, 0.0 }
  0x33   :  { %v107_v45 = vadd.f32 %v106_v44, %v105_v43 }
  0x34   :  { %110 = vst.msk [vmem:[#allocation8] sm:$0xff] %vm60_vm0, %v108_v41 }
  0x35   :  { %v109_v46 = vadd.f32 %v107_v45, %v88_v42 }
  0x37   :  { %111 = vst.msk [vmem:[#allocation8 + $0x8] sm:$0xff] %vm60_vm0, %v109_v46 }
  0x38   :  { %208 = shalt.err (!%p205_p5)
}
  0x39   :  { %123 = dma.vmem_to_hbm [thread:$0]  %s118_s2, 256, %s285_s3, [#allocation4], %s225_s17, %s225_s17, %s226_s18  }
  0x3a   :  { %221 = dma.done.wait [#allocation4], 256  }
  0x3b   :  { %222 = vsyncadd [#allocation4], 4294967040 }
  0x3c   :  { %127 = vsyncpa [#allocation3], 1 }
  0x3d   :  { %128 = vsyncpa [#allocation6], 1 }
  0x3e   :  { %129 = vsyncpa [#allocation4], 1 }

</bundles_post_ra>
